<compile_context>
chip_gen: v5e
topology: v5e:2x2
jax: 0.10.0
libtpu: 0.0.40
codegen_flags: <defaults>
</compile_context>

<pallas_src>
import jax
import jax.numpy as jnp
from jax.experimental import pallas as pl
from jax.experimental.pallas import tpu as pltpu


def _param_identity_kernel(p_ref, o_ref):
    # Pure scalar path: one sld + one sst in SMEM; no vector load/store slots,
    # no VMEM tile padding, no MXU/VPU work.
    o_ref[0] = p_ref[0]


def _param_identity_call(p1d: jax.Array) -> jax.Array:
    return pl.pallas_call(
        _param_identity_kernel,
        out_shape=jax.ShapeDtypeStruct((1,), p1d.dtype),  # dtype-preserving
        # Gridless whole-array specs: a 1-point grid would only add loop /
        # pipeline bookkeeping (~0.35 us) that dominates a kernel this small.
        in_specs=[pl.BlockSpec(memory_space=pltpu.MemorySpace.SMEM)],
        out_specs=pl.BlockSpec(memory_space=pltpu.MemorySpace.SMEM),
        # Output buffer == input buffer (effective because the jit boundary
        # donates the parameter buffer) -> no output HBM alloc / writeback.
        input_output_aliases={0: 0},
        # Zero-cost hint so XLA never serializes surrounding ops around this
        # custom call when it is embedded in a larger jit region.
        cost_estimate=pl.CostEstimate(flops=0, transcendentals=0, bytes_accessed=8),
        # No compiler_params on purpose: nothing to shard across v7x's 2 TCs,
        # zero VMEM used, so no per-generation tuning applies.
    )(p1d)


# pallas_call has no autodiff rule; the forward returns the parameter itself,
# so the VJP is the identity on the cotangent.
@jax.custom_vjp
def _param_identity(p1d: jax.Array) -> jax.Array:
    return _param_identity_call(p1d)


def _param_identity_fwd(p1d):
    return _param_identity_call(p1d), None


def _param_identity_bwd(_, g):
    return (g,)


_param_identity.defvjp(_param_identity_fwd, _param_identity_bwd)


def _forward(param_scalar: jax.Array) -> jax.Array:
    """Pallas equivalent of SimpleModel.forward(): return the scalar parameter.

    TODO(synk): outside this exercise, prefer `return param_scalar` directly —
    the kernel exists only because a pallas_call is required.
    """
    # 0-d -> (1,) for the SMEM ref. 1-D f32[1] pads to 4 bytes of SMEM; a 2-D
    # shape would pad to an [8,128]-word slab. The reshape is a bitcast in XLA.
    p1d = jnp.reshape(param_scalar, (1,))
    out1d = _param_identity(p1d)
    return jnp.reshape(out1d, ())           # back to 0-d, like torch.tensor(0.0)


# Created exactly once at module scope (no per-iteration retrace). The input
# buffer is donated so input_output_aliases={0:0} eliminates the output
# allocation and the 4-byte writeback DMA per call.
simple_model_forward = jax.jit(_forward, donate_argnums=0)


if __name__ == "__main__":
    # Deterministic parameter init, exactly as the module's __init__:
    # nn.Parameter(torch.tensor(0.0)) -> scalar f32 0.0.
    _ = jax.random.PRNGKey(0)  # unused: the parameter is constant-initialized
    param = jnp.array(0.0, dtype=jnp.float32)

    out = jax.block_until_ready(simple_model_forward(param))
    # NOTE: `param` is donated and must not be reused after this call.

    assert out.shape == ()
    assert out.dtype == jnp.float32
    assert float(out) == 0.0

    print("KERNEL_OK")
</pallas_src>

<mosaic_0001>
module attributes {stable_mosaic.version = 11 : i64} {
  func.func @_param_identity_kernel(%arg0: memref<1xf32, #tpu.memory_space<smem>>, %arg1: memref<1xf32, #tpu.memory_space<smem>>) attributes {dimension_semantics = [], scalar_prefetch = 0 : i64, scratch_operands = 0 : i64, tpu.core_type = #tpu.core_type<tc>} {
    %c0 = arith.constant 0 : index
    %0 = memref.load %arg0[%c0] : memref<1xf32, #tpu.memory_space<smem>>
    %c0_0 = arith.constant 0 : index
    %1 = memref.load %arg1[%c0_0] : memref<1xf32, #tpu.memory_space<smem>>
    memref.store %0, %arg1[%c0_0] : memref<1xf32, #tpu.memory_space<smem>>
    return
  }
}

</mosaic_0001>

<bundles_post_ra>
// kernel: _forward.1
= control target key start
LH: loop header
LB: loop body
LE: loop exit
PB: predicated region body
PF: predicated region fallthrough
CT: control target
= control target key end

     0   :  { %7 = vsyncpa [#allocation4], 0  ;;  %s43_s11 = smov [#allocation3]   ;;  %s60_s0 = inlined_call_operand.<no memory space> [shape: f32[1], index: 0, kind: input, shape index: {}, may-alias: {0,1}]   ;;  %s61_s1 = inlined_call_operand.hbm [shape: f32[1], index: 1, kind: output, shape index: {}, may-alias: {0,1}]  }
   0x1   :  { %12 = sst [smem:[#allocation3]] %s60_s0  ;;  %s18_s10 = sshll.u32 %s61_s1, 4  ;;  %s19_s10 = int_to_ptr.hbm [resolvable:$true] %s18_s10 }
   0x2   :  { %21 = dma.smem_to_hbm %s43_s11, 16, %s19_s10, [#allocation4]  }
   0x3   :  { %41 = dma.done.wait [#allocation4], 16  }
   0x4   :  { %42 = vsyncadd [#allocation4], 4294967280 }
   0x5   :  { %26 = sfence }
   0x6   :  { %27 = vsyncpa [#allocation4], 1 }

</bundles_post_ra>
